<compile_context>
chip_gen: v6e
topology: v6e:2x2x1
jax: 0.10.0
libtpu: 0.0.40
codegen_flags: <defaults>
</compile_context>

<pallas_src>
import math

import jax
import jax.numpy as jnp
from jax.experimental import pallas as pl
from jax.experimental.pallas import tpu as pltpu


def _ocn_att_kernel(u_add_ref, kc_add_ref, ol_ref, ok_ref,
                    w1_ref, w2_ref, w3_ref, out_ref):
    # Blocks: ol (Bt, L_ol, H), ok (Bt, L_ok, H),
    #         u_add (Bt, 1, L_ol)  = (1 - ol_mask) * -1e4                (f32)
    #         kc_add (Bt, L_ok, 1) = (1 - ok_mask) * -1e4 + (b1 + b2)    (f32)
    ol = ol_ref[...]                        # input dtype (MXU operand)
    ok = ok_ref[...]                        # input dtype (MXU operand)
    w1 = w1_ref[...]                        # (1, H), input dtype
    w3 = w3_ref[...]                        # (1, H), input dtype
    w2 = w2_ref[...].astype(jnp.float32)    # (1, H), f32 (elementwise path)

    H = ol.shape[-1]

    # --- Trilinear logits, transposed: logits_T[b, k, l] ------------------------
    # part3^T + part1  ==  <w3*ok_k + w1, ol_l>   (part1 fused into the MXU dot)
    okw = ok * w3 + w1                                              # (Bt, L_ok, H)
    logits = jnp.einsum("bkd,bld->bkl", okw, ol,
                        preferred_element_type=jnp.float32)         # (Bt, L_ok, L_ol) f32

    # Terms constant along the softmax (L_ol) axis:
    #   part2 (+ b1 + b2 folded host-side) + ok-mask term.  f32 on the VPU (v5e-safe).
    ok_f = ok.astype(jnp.float32)
    col = jnp.sum(ok_f * w2, axis=-1, keepdims=True) + kc_add_ref[...]  # (Bt, L_ok, 1)

    logits = logits + col + u_add_ref[...]                          # + ol-mask (Bt,1,L_ol)

    # --- softmax over the original dim=1 (L_ol) == lane axis here ---------------
    m = jnp.max(logits, axis=-1, keepdims=True)
    e = jnp.exp(logits - m)                                         # un-normalized weights
    denom = jnp.sum(e, axis=-1, keepdims=True)                      # (Bt, L_ok, 1) f32

    # --- _OLK directly in its final (L_ok, H) layout ------------------------------
    # Matmul on the un-normalized weights, then one EXACT divide on the small
    # (L_ok, H) result (identical math; avoids the approx-reciprocal error that
    # broke parity, and divides H lanes instead of L_ol lanes).
    olk = jnp.einsum("bkl,bld->bkd", e.astype(ol.dtype), ol,
                     preferred_element_type=jnp.float32)            # (Bt, L_ok, H) f32
    olk = olk / denom

    # --- output: [ok - _OLK, ok * _OLK] via two static half-slice stores ---------
    out_ref[:, :, :H] = (ok_f - olk).astype(out_ref.dtype)
    out_ref[:, :, H:] = (ok_f * olk).astype(out_ref.dtype)


def _pick_block_b(B, L_ol, L_ok, H, in_itemsize, out_itemsize, budget_bytes):
    """Largest divisor of B whose per-step VMEM working set fits `budget_bytes`,
    capped so the grid keeps >= 2 steps (v7x has 2 TensorCores)."""
    blk = (L_ol * H + L_ok * H) * in_itemsize \
        + (L_ol + L_ok) * 4 \
        + (L_ok * 2 * H) * out_itemsize
    interm = (2 * L_ok * L_ol + 2 * L_ok * H + 4 * L_ok) * 4   # logits/e/olk/col (f32)
    per_b = 2 * blk + interm                                    # x2: double-buffered blocks
    bt = max(1, int(budget_bytes // max(per_b, 1)))
    if B >= 2:
        bt = min(bt, B // 2)        # keep grid length >= 2 for the megacore split
    bt = max(1, min(bt, B))
    while B % bt:
        bt -= 1
    return bt


def ocn_att_layer(ol, ol_mask, ok, ok_mask, params, *, out_dtype=None,
                  vmem_block_budget_bytes=6 * 1024 * 1024):
    """ol: [B, L_ol, H], ol_mask: [B, L_ol], ok: [B, L_ok, H], ok_mask: [B, L_ok].
    Returns [B, L_ok, 2*H] (dtype = input dtype unless `out_dtype` is given, e.g. bf16)."""
    B, L_ol, H = ol.shape
    Bk, L_ok, Hk = ok.shape
    assert Bk == B and Hk == H
    out_dtype = ol.dtype if out_dtype is None else out_dtype
    f32 = jnp.float32

    ok = ok.astype(ol.dtype)
    # MXU-feeding weights stay in the input dtype; w2 (elementwise path) in f32.
    w1 = params["w1"].reshape(1, H).astype(ol.dtype)
    w3 = params["w3"].reshape(1, H).astype(ol.dtype)
    w2 = params["w2"].reshape(1, H).astype(f32)
    bias = params["b1"].reshape(()).astype(f32) + params["b2"].reshape(()).astype(f32)

    # Additive mask terms precomputed host-side in the transposed layout.
    # b1+b2 (constant over the whole logits matrix) is folded into the ok-side term.
    u_add = ((1.0 - ol_mask.astype(f32)) * -10000.0).reshape(B, 1, L_ol)
    kc_add = ((1.0 - ok_mask.astype(f32)) * -10000.0 + bias).reshape(B, L_ok, 1)

    bt = _pick_block_b(B, L_ol, L_ok, H,
                       jnp.dtype(ol.dtype).itemsize,
                       jnp.dtype(out_dtype).itemsize,
                       vmem_block_budget_bytes)

    def bspec(*shape):
        return pl.BlockSpec((bt,) + tuple(shape), lambda b: (b, 0, 0))

    wspec = pl.BlockSpec((1, H), lambda b: (0, 0))

    return pl.pallas_call(
        _ocn_att_kernel,
        out_shape=jax.ShapeDtypeStruct((B, L_ok, 2 * H), out_dtype),
        grid_spec=pltpu.PrefetchScalarGridSpec(
            num_scalar_prefetch=0,
            grid=(B // bt,),
            in_specs=[
                bspec(1, L_ol),      # u_add  (ol-mask term)
                bspec(L_ok, 1),      # kc_add (ok-mask term + b1 + b2)
                bspec(L_ol, H),      # ol
                bspec(L_ok, H),      # ok
                wspec,               # w1
                wspec,               # w2
                wspec,               # w3
            ],
            out_specs=bspec(L_ok, 2 * H),
        ),
        compiler_params=pltpu.CompilerParams(
            dimension_semantics=("parallel",),
            vmem_limit_bytes=32 * 1024 * 1024,
        ),
    )(u_add, kc_add, ol, ok, w1, w2, w3)


def ocn_att_layer_ref(ol, ol_mask, ok, ok_mask, params):
    """Pure-JAX reference mirroring the PyTorch forward exactly."""
    H = ol.shape[-1]
    w1 = params["w1"].reshape(1, 1, H)
    b1 = params["b1"].reshape(())
    w2 = params["w2"].reshape(1, 1, H)
    b2 = params["b2"].reshape(())
    w3 = params["w3"].reshape(1, 1, H)

    part1 = jnp.sum(ol * w1, -1, keepdims=True) + b1                      # [B,Lol,1]
    part2 = (jnp.sum(ok * w2, -1, keepdims=True) + b2).transpose(0, 2, 1) # [B,1,Lok]
    part3 = jnp.einsum("bld,bkd->blk", w3 * ol, ok)                       # [B,Lol,Lok]
    um = (1.0 - ol_mask.astype(jnp.float32)) * -10000.0
    vm = (1.0 - ok_mask.astype(jnp.float32)) * -10000.0
    A = part1 + part2 + part3 + um[:, :, None] + vm[:, None, :]
    att = jax.nn.softmax(A, axis=1)
    _OLK = jnp.einsum("bld,blk->bkd", ol, att)                            # [B,Lok,H]
    return jnp.concatenate([ok - _OLK, ok * _OLK], axis=2)


def init_params(hidden_size, key):
    k1, k2, k3, k4, k5 = jax.random.split(key, 5)
    # Synthetic init mimicking the PyTorch shapes:
    #   W1, W2: Linear(hidden, 1); W3: (1, 1, hidden).
    bound = 1.0 / math.sqrt(hidden_size)
    return {
        "w1": jax.random.uniform(k1, (1, hidden_size), jnp.float32, -bound, bound),
        "b1": jax.random.uniform(k2, (1,), jnp.float32, -bound, bound),
        "w2": jax.random.uniform(k3, (1, hidden_size), jnp.float32, -bound, bound),
        "b2": jax.random.uniform(k4, (1,), jnp.float32, -bound, bound),
        "w3": jax.random.uniform(k5, (1, 1, hidden_size), jnp.float32, -bound, bound),
    }


if __name__ == "__main__":
    B, L_OL, L_OK, H = 2, 8, 8, 32
    key = jax.random.PRNGKey(0)
    k_ol, k_ok, k_p = jax.random.split(key, 3)

    ol = jax.random.normal(k_ol, (B, L_OL, H), jnp.float32)
    ok = jax.random.normal(k_ok, (B, L_OK, H), jnp.float32)
    # Masks: 1 = valid token, 0 = padding (make the last positions padded).
    ol_mask = jnp.concatenate(
        [jnp.ones((B, L_OL - 2), jnp.float32), jnp.zeros((B, 2), jnp.float32)], axis=1)
    ok_mask = jnp.concatenate(
        [jnp.ones((B, L_OK - 1), jnp.float32), jnp.zeros((B, 1), jnp.float32)], axis=1)

    params = init_params(H, k_p)

    out = ocn_att_layer(ol, ol_mask, ok, ok_mask, params)
    out = jax.block_until_ready(out)

    ref = ocn_att_layer_ref(ol, ol_mask, ok, ok_mask, params)
    assert out.shape == (B, L_OK, 2 * H), out.shape
    err = float(jnp.max(jnp.abs(out - ref)))
    assert jnp.allclose(out, ref, atol=2e-3, rtol=1e-3), err

    print("KERNEL_OK")
</pallas_src>

<mosaic_0001>
module attributes {stable_mosaic.version = 11 : i64} {
  func.func @_ocn_att_kernel(%arg0: i32, %arg1: memref<1x1x8xf32, #tpu.memory_space<vmem>>, %arg2: memref<1x8x1xf32, #tpu.memory_space<vmem>>, %arg3: memref<1x8x32xf32, #tpu.memory_space<vmem>>, %arg4: memref<1x8x32xf32, #tpu.memory_space<vmem>>, %arg5: memref<1x32xf32, #tpu.memory_space<vmem>>, %arg6: memref<1x32xf32, #tpu.memory_space<vmem>>, %arg7: memref<1x32xf32, #tpu.memory_space<vmem>>, %arg8: memref<1x8x64xf32, #tpu.memory_space<vmem>>) attributes {dimension_semantics = [#tpu.dimension_semantics<parallel>], iteration_bounds = array<i64: 2>, scalar_prefetch = 0 : i64, scratch_operands = 0 : i64, tpu.core_type = #tpu.core_type<tc>, window_params = [{transform_indices = @transform_0, window_bounds = array<i64: 1, 1, 8>}, {transform_indices = @transform_1, window_bounds = array<i64: 1, 8, 1>}, {transform_indices = @transform_2, window_bounds = array<i64: 1, 8, 32>}, {transform_indices = @transform_3, window_bounds = array<i64: 1, 8, 32>}, {pipeline_mode = #tpu.pipeline_mode<synchronous>, transform_indices = @transform_4, window_bounds = array<i64: 1, 32>}, {pipeline_mode = #tpu.pipeline_mode<synchronous>, transform_indices = @transform_5, window_bounds = array<i64: 1, 32>}, {pipeline_mode = #tpu.pipeline_mode<synchronous>, transform_indices = @transform_6, window_bounds = array<i64: 1, 32>}, {transform_indices = @transform_7, window_bounds = array<i64: 1, 8, 64>}]} {
    %c0 = arith.constant 0 : index
    %c0_0 = arith.constant 0 : index
    %c0_1 = arith.constant 0 : index
    %0 = vector.load %arg3[%c0, %c0_0, %c0_1] : memref<1x8x32xf32, #tpu.memory_space<vmem>>, vector<1x8x32xf32>
    %c0_2 = arith.constant 0 : index
    %c0_3 = arith.constant 0 : index
    %c0_4 = arith.constant 0 : index
    %1 = vector.load %arg4[%c0_2, %c0_3, %c0_4] : memref<1x8x32xf32, #tpu.memory_space<vmem>>, vector<1x8x32xf32>
    %c0_5 = arith.constant 0 : index
    %c0_6 = arith.constant 0 : index
    %2 = vector.load %arg5[%c0_5, %c0_6] : memref<1x32xf32, #tpu.memory_space<vmem>>, vector<1x32xf32>
    %c0_7 = arith.constant 0 : index
    %c0_8 = arith.constant 0 : index
    %3 = vector.load %arg7[%c0_7, %c0_8] : memref<1x32xf32, #tpu.memory_space<vmem>>, vector<1x32xf32>
    %c0_9 = arith.constant 0 : index
    %c0_10 = arith.constant 0 : index
    %4 = vector.load %arg6[%c0_9, %c0_10] : memref<1x32xf32, #tpu.memory_space<vmem>>, vector<1x32xf32>
    %5 = vector.shape_cast %3 : vector<1x32xf32> to vector<1x1x32xf32>
    %6 = vector.broadcast %5 : vector<1x1x32xf32> to vector<1x8x32xf32>
    %7 = arith.mulf %1, %6 : vector<1x8x32xf32>
    %8 = vector.shape_cast %2 : vector<1x32xf32> to vector<1x1x32xf32>
    %9 = vector.broadcast %8 : vector<1x1x32xf32> to vector<1x8x32xf32>
    %10 = arith.addf %7, %9 : vector<1x8x32xf32>
    "tpu.trace_start"() <{level = 10 : i32, message = "bkd,bld->bkl"}> : () -> ()
    %cst = arith.constant dense<0.000000e+00> : vector<1x8x8xf32>
    %11 = tpu.matmul %10, %0, %cst {dimension_numbers = #tpu.dot_dimension_numbers<[2], [2], [1], [1], [0, 0, 0, 1, 1, 1], [0], [0]>} : vector<1x8x32xf32>, vector<1x8x32xf32>, vector<1x8x8xf32> -> vector<1x8x8xf32>
    "tpu.trace_stop"() : () -> ()
    %12 = vector.shape_cast %4 : vector<1x32xf32> to vector<1x1x32xf32>
    %13 = vector.broadcast %12 : vector<1x1x32xf32> to vector<1x8x32xf32>
    %14 = arith.mulf %1, %13 : vector<1x8x32xf32>
    %cst_11 = arith.constant dense<0.000000e+00> : vector<1x8xf32>
    %15 = vector.multi_reduction <add>, %14, %cst_11 [2] : vector<1x8x32xf32> to vector<1x8xf32>
    %16 = vector.shape_cast %15 : vector<1x8xf32> to vector<1x8x1xf32>
    %c0_12 = arith.constant 0 : index
    %c0_13 = arith.constant 0 : index
    %c0_14 = arith.constant 0 : index
    %17 = vector.load %arg2[%c0_12, %c0_13, %c0_14] : memref<1x8x1xf32, #tpu.memory_space<vmem>>, vector<1x8x1xf32>
    %18 = arith.addf %16, %17 : vector<1x8x1xf32>
    %19 = vector.broadcast %18 : vector<1x8x1xf32> to vector<1x8x8xf32>
    %20 = arith.addf %11, %19 : vector<1x8x8xf32>
    %c0_15 = arith.constant 0 : index
    %c0_16 = arith.constant 0 : index
    %c0_17 = arith.constant 0 : index
    %21 = vector.load %arg1[%c0_15, %c0_16, %c0_17] : memref<1x1x8xf32, #tpu.memory_space<vmem>>, vector<1x1x8xf32>
    %22 = vector.broadcast %21 : vector<1x1x8xf32> to vector<1x8x8xf32>
    %23 = arith.addf %20, %22 : vector<1x8x8xf32>
    %cst_18 = arith.constant dense<0xFF800000> : vector<1x8xf32>
    %24 = vector.multi_reduction <maximumf>, %23, %cst_18 [2] : vector<1x8x8xf32> to vector<1x8xf32>
    %25 = vector.shape_cast %24 : vector<1x8xf32> to vector<1x8x1xf32>
    %26 = vector.broadcast %25 : vector<1x8x1xf32> to vector<1x8x8xf32>
    %27 = arith.subf %23, %26 : vector<1x8x8xf32>
    %28 = math.exp %27 : vector<1x8x8xf32>
    %cst_19 = arith.constant dense<0.000000e+00> : vector<1x8xf32>
    %29 = vector.multi_reduction <add>, %28, %cst_19 [2] : vector<1x8x8xf32> to vector<1x8xf32>
    %30 = vector.shape_cast %29 : vector<1x8xf32> to vector<1x8x1xf32>
    "tpu.trace_start"() <{level = 10 : i32, message = "bkl,bld->bkd"}> : () -> ()
    %cst_20 = arith.constant dense<0.000000e+00> : vector<1x8x32xf32>
    %31 = tpu.matmul %28, %0, %cst_20 {dimension_numbers = #tpu.dot_dimension_numbers<[2], [1], [1], [2], [0, 0, 0, 1, 1, 2], [0], [0]>} : vector<1x8x8xf32>, vector<1x8x32xf32>, vector<1x8x32xf32> -> vector<1x8x32xf32>
    "tpu.trace_stop"() : () -> ()
    %32 = vector.broadcast %30 : vector<1x8x1xf32> to vector<1x8x32xf32>
    %33 = arith.divf %31, %32 : vector<1x8x32xf32>
    %34 = arith.subf %1, %33 : vector<1x8x32xf32>
    %c0_21 = arith.constant 0 : index
    %c0_22 = arith.constant 0 : index
    %c0_23 = arith.constant 0 : index
    %35 = vector.load %arg8[%c0_21, %c0_22, %c0_23] : memref<1x8x64xf32, #tpu.memory_space<vmem>>, vector<1x8x32xf32>
    tpu.vector_store %arg8[%c0_21, %c0_22, %c0_23], %34 {strides = array<i32>} : memref<1x8x64xf32, #tpu.memory_space<vmem>>, vector<1x8x32xf32>,
    %36 = arith.mulf %1, %33 : vector<1x8x32xf32>
    %c0_24 = arith.constant 0 : index
    %c0_25 = arith.constant 0 : index
    %c32 = arith.constant 32 : index
    %37 = vector.load %arg8[%c0_24, %c0_25, %c32] : memref<1x8x64xf32, #tpu.memory_space<vmem>>, vector<1x8x32xf32>
    tpu.vector_store %arg8[%c0_24, %c0_25, %c32], %36 {strides = array<i32>} : memref<1x8x64xf32, #tpu.memory_space<vmem>>, vector<1x8x32xf32>,
    return
  }
  func.func @transform_0(%arg0: i32) -> (i32, i32, i32) {
    %c0_i32 = arith.constant 0 : i32
    %c0_i32_0 = arith.constant 0 : i32
    %c0_i32_1 = arith.constant 0 : i32
    return %arg0, %c0_i32, %c0_i32_0 : i32, i32, i32
  }
  func.func @transform_1(%arg0: i32) -> (i32, i32, i32) {
    %c0_i32 = arith.constant 0 : i32
    %c0_i32_0 = arith.constant 0 : i32
    %c0_i32_1 = arith.constant 0 : i32
    return %arg0, %c0_i32, %c0_i32_0 : i32, i32, i32
  }
  func.func @transform_2(%arg0: i32) -> (i32, i32, i32) {
    %c0_i32 = arith.constant 0 : i32
    %c0_i32_0 = arith.constant 0 : i32
    %c0_i32_1 = arith.constant 0 : i32
    return %arg0, %c0_i32, %c0_i32_0 : i32, i32, i32
  }
  func.func @transform_3(%arg0: i32) -> (i32, i32, i32) {
    %c0_i32 = arith.constant 0 : i32
    %c0_i32_0 = arith.constant 0 : i32
    %c0_i32_1 = arith.constant 0 : i32
    return %arg0, %c0_i32, %c0_i32_0 : i32, i32, i32
  }
  func.func @transform_4(%arg0: i32) -> (i32, i32) {
    %c0_i32 = arith.constant 0 : i32
    %c0_i32_0 = arith.constant 0 : i32
    %c0_i32_1 = arith.constant 0 : i32
    return %c0_i32, %c0_i32_0 : i32, i32
  }
  func.func @transform_5(%arg0: i32) -> (i32, i32) {
    %c0_i32 = arith.constant 0 : i32
    %c0_i32_0 = arith.constant 0 : i32
    %c0_i32_1 = arith.constant 0 : i32
    return %c0_i32, %c0_i32_0 : i32, i32
  }
  func.func @transform_6(%arg0: i32) -> (i32, i32) {
    %c0_i32 = arith.constant 0 : i32
    %c0_i32_0 = arith.constant 0 : i32
    %c0_i32_1 = arith.constant 0 : i32
    return %c0_i32, %c0_i32_0 : i32, i32
  }
  func.func @transform_7(%arg0: i32) -> (i32, i32, i32) {
    %c0_i32 = arith.constant 0 : i32
    %c0_i32_0 = arith.constant 0 : i32
    %c0_i32_1 = arith.constant 0 : i32
    return %arg0, %c0_i32, %c0_i32_0 : i32, i32, i32
  }
}

</mosaic_0001>

<bundles_post_ra>
// kernel: tpu_custom_call.1
= control target key start
LH: loop header
LB: loop body
LE: loop exit
PB: predicated region body
PF: predicated region fallthrough
CT: control target
= control target key end

     0   :  { %12 = vsyncpa [#allocation3], 0  ;;  %s1083_s0 = inlined_call_operand.vmem [shape: f32[2,1,8], index: 0, kind: input, shape index: {}]   ;;  %s1084_s1 = inlined_call_operand.vmem [shape: f32[2,8,1], index: 1, kind: input, shape index: {}]   ;;  %s1085_s2 = inlined_call_operand.vmem [shape: f32[2,8,32], index: 2, kind: input, shape index: {}]   ;;  %s1086_s3 = inlined_call_operand.hbm [shape: f32[2,8,32], index: 3, kind: input, shape index: {}]   ;;  %s1087_s4 = inlined_call_operand.vmem [shape: f32[1,32], index: 4, kind: input, shape index: {}]   ;;  %s1088_s5 = inlined_call_operand.vmem [shape: f32[1,32], index: 5, kind: input, shape index: {}]   ;;  %s1089_s6 = inlined_call_operand.vmem [shape: f32[1,32], index: 6, kind: input, shape index: {}]   ;;  %s1090_s7 = inlined_call_operand.hbm [shape: f32[2,8,64], index: 7, kind: output, shape index: {}]  }
   0x1   :  { %14 = vsyncpa [#allocation3 + $0x1], 0 }
   0x2   :  { %15 = vsyncpa [#allocation4], 0 }
   0x3   :  { %17 = vsyncpa [#allocation4 + $0x1], 0  ;;  %s904_s24 = smov 0   ;;  %s906_s25 = smov 0  }
   0x4   :  { %s908_s26 = smov 0   ;;  %s910_s27 = smov 0  }
   0x5 LB: > { %s925_s28 = sadd.s32 4294967295, %s856_s27   ;;  %s674_s29 = sadd.s32 4294967294, %s856_s27   ;;  %s856_s27 = sphi %s910_s27, %s1107_s27   ;;  %s852_s26 = sphi %s908_s26, %s1106_s26   ;;  %s848_s25 = sphi %s906_s25, %s1105_s25   ;;  %s844_s24 = sphi %s904_s24, %s1104_s24  }
   0x6   : > { %s929_s30 = sadd.s32 1, %s856_s27   ;;  %s108_s8 = sadd.s32 1, %s852_s26 }
   0x7   : > { %s105_s9 = ssub.s32 %s856_s27, %s929_s30  ;;  %p115_p0 = scmp.ne.s32.totalorder %s852_s26, %s848_s25 }
   0x8   : > { %p106_p1 = scmp.eq.s32.totalorder %s105_s9, 0  ;;  %p116_p2 = scmp.eq.s32.totalorder %s856_s27, 0 }
   0x9   : > { %p121_p3 = scmp.ne.s32.totalorder %s848_s25, %s844_s24  ;;  %p122_p4 = scmp.eq.s32.totalorder %s925_s28, 0 }
   0xa   : > { %s941_s10 = scalar_select %p106_p1, %s852_s26, %s108_s8  }
   0xb   : > { %p943_p5 = por %p116_p2, %p115_p0  ;;  %p947_p6 = por %p122_p4, %p121_p3 }
   0xc   : > { %p208_p7 = scmp.eq.s32.totalorder %s925_s28, 1  ;;  %p214_p8 = scmp.eq.s32.totalorder %s674_s29, 1 }
   0xd   : > { %s1094_s12 = scalar_select %p947_p6, 1, 0 }
   0xe   : > { %p721_p10 = scmp.lt.s32.totalorder %s856_s27, 2  ;;  %p954_p11 = por %p208_p7, %p115_p0 }
   0xf   : > { %p958_p12 = por %p214_p8, %p121_p3  ;;  %s263_s15 = sand.u32 1, %s852_s26  }
  0x10   : > { %s1095_s13 = scalar_select %p954_p11, 1, 0 }
  0x11   : > { %s1096_s14 = scalar_select %p958_p12, 1, 0 }
  0x12   : > { %s678_s16 = sshll.u32 %s856_s27, 7  ;;  %s677_s17 = sshll.u32 %s263_s15, 3 }
  0x13   : > { %s967_s20 = scalar_lea.hbm %s1086_s3, %s678_s16  ;;  %s267_s21 = scalar_lea.vmem [#allocation2], %s677_s17 }
  0x14   : > { %s274_s22 = sshll.u32 %s267_s21, 4  ;;  %p971_p13 = pnand %p721_p10, %p943_p5  ;;  %s975_s22 = int_to_ptr.vmem [resolvable:$true] %s274_s22 }
  0x15   : > { %s264_s29 = scalar_lea.sflag [#allocation3], %s263_s15  ;;  %s764_s8 = scalar_lea.hbm %s967_s20, 128 }
  0x16   : > { %p765_p2 = scmp.ne.s32.totalorder %s967_s20, %s764_s8  ;;  %p766_p3 = pneg %p971_p13 }
  0x17   : > { %s769_s11 = scalar_lea.hbm %s1086_s3, 256  ;;  %p770_p5 = scmp.lt.s32.totalorder %s967_s20, %s1086_s3 }
  0x18   : > { %p767_p4 = pnand %p766_p3, %p765_p2  ;;  %p771_p8 = scmp.lt.s32.totalorder %s769_s11, %s764_s8 }
  0x1a   : > { %p768_p7 = pneg %p767_p4  ;;  %p772_p10 = por %p771_p8, %p770_p5 }
  0x1c   : > { %p773_p9 = pnand %p772_p10, %p768_p7 }
  0x1e   : > { %776 = shalt.err (!%p773_p9)
}
  0x1f   : > { %s777_s15 = scalar_lea.vmem %s975_s22, 128  ;;  %s858_s19 = smov [#allocation2]  }
  0x20   : > { %p778_p0 = scmp.ne.s32.totalorder %s975_s22, %s777_s15  ;;  %s782_s21 = sshll.u32 %s858_s19, 4  ;;  %s783_s21 = int_to_ptr.vmem [resolvable:$false] %s782_s21 }
  0x21   : > { %s784_s9 = scalar_lea.vmem %s783_s21, 256  ;;  %p785_p4 = scmp.lt.s32.totalorder %s975_s22, %s783_s21 }
  0x22   : > { %p780_p1 = pnand %p778_p0, %p766_p3  ;;  %p786_p12 = scmp.lt.s32.totalorder %s784_s9, %s777_s15 }
  0x24   : > { %p781_p2 = pneg %p780_p1  ;;  %p787_p11 = por %p786_p12, %p785_p4 }
  0x26   : > { %p788_p6 = pnand %p787_p11, %p781_p2 }
  0x28   : > { %791 = shalt.err (!%p788_p6)
}
  0x29   : > { %716 = dma.hbm_to_vmem [thread:$0]  (!%p971_p13), %s967_s20, 128, %s975_s22, %s264_s29  }
  0x2a   : > { %p1098_p9 = scmp.lt.s32.totalorder %s856_s27, 3  ;;  %p1099_p7 = scmp.ge.s32.totalorder %s856_s27, 1 }
  0x2c   : > { %p280_p0 = pnand %p1099_p7, %p1098_p9 }
  0x2d   : > { %s1002_s8 = sand.u32 (!%p280_p0), 1, %s848_s25   ;;  %p1100_p6 = scmp.ne.s32.totalorder (!%p280_p0), %s1094_s12, 0 }
  0x2e   : > { %283 = sbr.rel (%p280_p0) target bundleno = 807 (0x327), region = 48  ;;  %s680_s16 = sshll.u32 (!%p280_p0), %s1002_s8, 3 }
  0x2f   : > { %s286_s11 = scalar_lea.sflag (!%p280_p0), [#allocation3], %s1002_s8  ;;  %s289_s23 = scalar_lea.vmem (!%p280_p0), [#allocation2], %s680_s16 }
  0x33   : > { %835 = dma.done.wait (%p1100_p6), %s286_s11, 128  }
  0x34   : > { %837 = vsyncadd (%p1100_p6), %s286_s11, 4294967168  ;;  %p331_p11 = scmp.lt.s32.totalorder %s925_s28, 1  ;;  %v859_v0 = vmov 0.0   ;;  %vm860_vm0 = vmmov 0   ;;  %v343_v1 = vld [vmem:[%s289_s23] sm:$0xff]  ;;  %vm368_vm1 = vcmask 261120  }
  0x35   : > { %699 = vmatprep.subr.mxu0 %v859_v0  ;;  %701 = vmatprep.mubr.msk.f32.mxu0 %vm860_vm0, %v859_v0  ;;  %v686_v2 = vld [vmem:[%s1088_s5] ss:$0 sm:$0xff]  ;;  %v861_v10 = vmov 0   ;;  %vm463_vm2 = vcmask 64512   ;;  %s692_s19 = sshll.u32 %s925_s28, 7  ;;  %vm555_vm3 = vcmask 523520  }
  0x36   : > { %s1014_s20 = scalar_select %p331_p11, %s925_s28, 1  ;;  %704 = vmatprep.subr.mxu1 %v859_v0  ;;  %706 = vmatprep.mubr.msk.f32.mxu1 %vm860_vm0, %v859_v0  ;;  %v367_v4 = vmul.f32 %v686_v2, %v343_v1  ;;  %v685_v5 = vld [vmem:[%s1087_s4] ss:$0 sm:$0xff] }
  0x37   : > { %v684_v6 = vld [vmem:[%s1089_s6] ss:$0 sm:$0xff]  ;;  %759 = vset.pattern.permute.xlu0 %v861_v10  ;;  %s1046_s23 = scalar_lea.hbm %s1090_s7, %s692_s19  ;;  %s558_s29 = scalar_lea.sflag [#allocation4], %s1002_s8 }
  0x38   : > { %s682_s22 = sshll.u32 %s1014_s20, 3  ;;  %v353_v7 = vmul.f32 %v684_v6, %v343_v1  ;;  %v369_v8 = vsel %vm368_vm1, %v367_v4, 0.0  ;;  %s333_s15 = scalar_lea.vmem %s1083_s0, %s1014_s20 }
  0x39   : > { %s341_s18 = scalar_lea.vmem %s1085_s2, %s682_s22  ;;  %370 = vadd.xlane.f32.xlu0 %v369_v8  ;;  %s337_s17 = scalar_lea.vmem %s1084_s1, %s682_s22  ;;  %v689_v17 = vld [vmem:[%s333_s15] ss:$0 sm:$0xff] }
  0x3a   : > { %v342_v3 = vld [vmem:[%s341_s18] sm:$0xff]  ;;  %v360_v9 = vadd.f32 %v685_v5, %v353_v7  ;;  %s862_s20 = smov 32   ;;  %s330_s22 = scalar_lea.vmem [#allocation5], %s680_s16 }
  0x3b   : > { %700 = vmatpush3.xpose.msk.msra.mxu0 %vm368_vm1, %v342_v3  ;;  %705 = vmatpush3.msra.mxu1 %v342_v3  ;;  %v372_v11 = vld [vmem:[%s337_s17] sm:$0xff]  ;;  %s571_s21 = sshll.u32 %s330_s22, 4  ;;  %p1101_p13 = scmp.ne.s32.totalorder %s1095_s13, 0  ;;  %s572_s21 = int_to_ptr.vmem [resolvable:$true] %s571_s21 }
  0x3c   : > { %s792_s17 = scalar_lea.vmem %s572_s21, 128  ;;  %s863_s16 = smov [#allocation5]  }
  0x3d   : > { %p793_p12 = scmp.ne.s32.totalorder %s572_s21, %s792_s17  ;;  %s796_s18 = sshll.u32 %s863_s16, 4  ;;  %s797_s18 = int_to_ptr.vmem [resolvable:$false] %s796_s18 }
  0x3e   : > { %702 = vmatmul.mubr.msk.f32.vlgmr.msra.gmra.mxu0 %vm368_vm1, %v360_v9  ;;  %s798_s28 = scalar_lea.vmem %s797_s18, 256  ;;  %p799_p5 = scmp.lt.s32.totalorder %s572_s21, %s797_s18 }
  0x3f   : > { %p794_p1 = pnand %p793_p12, %p1101_p13  ;;  %p800_p8 = scmp.lt.s32.totalorder %s798_s28, %s792_s17 }
  0x41   : > { %p795_p3 = pneg %p794_p1  ;;  %p801_p10 = por %p800_p8, %p799_p5 }
  0x43   : > { %p802_p2 = pnand %p801_p10, %p795_p3 }
  0xc2   : > { %v371_v12 = vpop.xlane.xlu0 %370 }
  0xc3   : > { %v373_v13 = vadd.f32 %v372_v11, %v371_v12 }
  0xc5   : > { %376 = vperm.xlu0 %759, %v373_v13  }
  0xfe   : > { %v451_v14 = vpop.f32.mrf.mxu0 }
 0x100   : > { %v703_v15 = vpop.f32.mrf.mxu0 }
 0x140   : > { %v377_v16 = vpop.permute.xlu0 %376 }
 0x141   : > { %v452_v18 = vadd.f32 %v451_v14, %v377_v16 }
 0x143   : > { %v462_v19 = vadd.f32 %v689_v17, %v452_v18 }
 0x145   : > { %v464_v20 = vsel %vm463_vm2, %v462_v19, -inf }
 0x146   : > { %465 = vmax.xlane.f32.xlu1 %v464_v20 }
 0x1cf   : > { %v466_v21 = vpop.xlane.xlu1 %465 }
 0x1d0   : > { %v467_v22 = vsub.f32 %v462_v19, %v466_v21 }
 0x1d2   : > { %v468_v23 = vmul.f32 1.442695, %v467_v22 }
 0x1d4   : > { %760 = vpow2.f32 %v468_v23 }
 0x1e1   : > { %v761_v24 = vpop.eup %760 }
 0x1e2   : > { %707 = vmatmul.mubr.msk.f32.vlgmr.msra.gmra.mxu1 %vm463_vm2, %v761_v24  ;;  %v470_v25 = vsel %vm463_vm2, %v761_v24, 0.0 }
 0x1e3   : > { %471 = vadd.xlane.f32.xlu1 %v470_v25 }
 0x26c   : > { %v472_v26 = vpop.xlane.xlu1 %471 }
 0x26d   : > { %762 = vrcp.f32 %v472_v26 }
 0x27a   : > { %v763_v27 = vpop.eup %762 }
 0x2a2   : > { %v542_v28 = vpop.f32.mrf.mxu1 }
 0x2a3   : > { %v547_v29 = vmul.f32 %v763_v27, %v542_v28 }
 0x2a4   : > { %v708_v30 = vpop.f32.mrf.mxu1 }
 0x2a5   : > { %v548_v31 = vsub.f32 %v343_v1, %v547_v29  ;;  %v550_v32 = vmul.f32 %v547_v29, %v343_v1 }
 0x2a7   : > { %552 = vrot.lane.b32.xlu1 %v550_v32, %s862_s20  ;;  %549 = vst.msk [vmem:[%s330_s22] sm:$0xff] %vm368_vm1, %v548_v31 }
 0x319   : > { %v553_v33 = vpop.permute.xlu1 %552 }
 0x31a   : > { %556 = vst.msk [vmem:[%s330_s22] sm:$0xff] %vm555_vm3, %v553_v33 }
 0x31b   : > { %805 = shalt.err (!%p802_p2)
}
 0x31c   : > { %s806_s12 = scalar_lea.hbm %s1046_s23, 128  ;;  %s810_s20 = scalar_lea.hbm %s1090_s7, 256 }
 0x31d   : > { %p807_p4 = scmp.ne.s32.totalorder %s1046_s23, %s806_s12  ;;  %p811_p0 = scmp.lt.s32.totalorder %s1046_s23, %s1090_s7 }
 0x31e   : > { %p812_p6 = scmp.lt.s32.totalorder %s810_s20, %s806_s12 }
 0x31f   : > { %p808_p9 = pnand %p807_p4, %p1101_p13 }
 0x320   : > { %p813_p11 = por %p812_p6, %p811_p0 }
 0x321   : > { %p809_p7 = pneg %p808_p9 }
 0x323   : > { %p814_p12 = pnand %p813_p11, %p809_p7 }
 0x325   : > { %817 = shalt.err (!%p814_p12)
}
 0x326   : > { %711 = dma.vmem_to_hbm [thread:$0]  (%p1101_p13), %s572_s21, 128, %s1046_s23, %s558_s29  }
 0x327 PF: > { %s583_s9 = sand.u32 1, %s844_s24   ;;  %p1102_p1 = scmp.ne.s32.totalorder %s1096_s14, 0 }
 0x328   : > { %p1103_p3 = scmp.ge.s32.totalorder %s856_s27, 2  ;;  %s584_s11 = scalar_lea.sflag [#allocation4], %s583_s9 }
 0x32a   : > { %p718_p5 = pnand %p1103_p3, %p1102_p1 }
 0x32c   : > { %p719_p8 = pneg %p718_p5 }
 0x32e   : > { %839 = dma.done.wait (%p719_p8), %s584_s11, 128  }
 0x32f   : > { %841 = vsyncadd (%p719_p8), %s584_s11, 4294967168  ;;  %p20_p10 = scmp.ge.s32.totalorder %s929_s30, 4   ;;  %s1104_s24 = smov %s848_s25 }
 0x330   : > { %s1105_s25 = smov %s852_s26  ;;  %s1106_s26 = smov %s941_s10 }
 0x331   : > { %s1107_s27 = smov %s929_s30  ;;  %22 = sbr.rel (!%p20_p10) target bundleno = 5 (0x5), region = 102 }
 0x336   :  { %589 = vsyncpa [#allocation3], 1 }
 0x337   :  { %591 = vsyncpa [#allocation3 + $0x1], 1 }
 0x338   :  { %592 = vsyncpa [#allocation4], 1 }
 0x339   :  { %594 = vsyncpa [#allocation4 + $0x1], 1 }

</bundles_post_ra>
